<compile_context>
chip_gen: v6e
topology: v6e:2x2x1
jax: 0.10.0
libtpu: 0.0.40
codegen_flags: <defaults>
</compile_context>

<pallas_src>
import math

import jax
import jax.numpy as jnp
from jax.experimental import pallas as pl
from jax.experimental.pallas import tpu as pltpu

_HID = 10  # hidden units per net


def _two_mlp_kernel(p_ref, x_ref, y1_ref, y2_ref):
    """Fused forward for both MLPs on one lane-dense batch tile.

    p_ref : SMEM f32[64] packed parameters
            [ 0:10) w1a  [10:20) b1a  [20:30) w2a
            [30:40) w1b  [40:50) b1b  [50:60) w2b
            [60] b2a     [61] b2b     [62:64) pad
    x_ref : VMEM f32[BR, BC]  batch elements (lane-dense layout)
    """
    x = x_ref[...]

    def run_net(w1_off, b1_off, w2_off, b2_idx):
        # Two partial sums (pairwise) + bias-seeded accumulator: shorter serial
        # dependency chain than one 10-deep acc += h*w chain.
        acc0 = jnp.full_like(x, p_ref[b2_idx])
        acc1 = jnp.zeros_like(x)
        for j in range(_HID):  # unrolled: scalar*vector FMAs (VPU) + tanh (EUP)
            h = jnp.tanh(x * p_ref[w1_off + j] + p_ref[b1_off + j])
            if j & 1:
                acc1 = acc1 + h * p_ref[w2_off + j]
            else:
                acc0 = acc0 + h * p_ref[w2_off + j]
        return acc0 + acc1

    y1_ref[...] = run_net(0, 10, 20, 60)
    y2_ref[...] = run_net(30, 40, 50, 61)


def _pack_params(p):
    """Pack all weights/biases of both nets into one f32[64] slab (SMEM)."""
    flat = jnp.concatenate([
        p["w1a"].ravel(), p["b1a"].ravel(), p["w2a"].ravel(),
        p["w1b"].ravel(), p["b1b"].ravel(), p["w2b"].ravel(),
        p["b2a"].ravel(), p["b2b"].ravel(),
        jnp.zeros((2,), jnp.float32),      # pad 62 -> 64
    ]).astype(jnp.float32)
    return flat


def _round_up(v, m):
    return ((v + m - 1) // m) * m


def _choose_block(n, bc=512):
    """Lane-dense tiling: always bc=512 lanes; rows per block scale with batch.

    Returns (block_rows, block_cols, num_blocks)."""
    rows = max(1, math.ceil(n / bc))
    rows8 = _round_up(rows, 8)
    if rows8 <= 512:
        # One block covers the whole batch: single grid step, no per-step
        # pipeline overhead to amortize. (<= 1 MiB per buffer.)
        return rows8, bc, 1
    # Multi-block path: ~256-row blocks (~0.5 MiB x per step, ~3 MiB
    # double-buffered incl. both outputs) and an EVEN block count so v7x's
    # two TensorCores split the "parallel" grid evenly.
    nb = math.ceil(rows8 / 256)
    if nb % 2:
        nb += 1
    br = _round_up(math.ceil(rows8 / nb), 8)
    return br, bc, nb


def two_mlp_forward(x, params):
    """x: (N, 1) float32  ->  (y1, y2) each (N, 1) float32 (matches PyTorch Model)."""
    n = x.shape[0]
    br, bc, nb = _choose_block(n)
    rows_p = nb * br
    n_pad = rows_p * bc

    xf = x.reshape(-1).astype(jnp.float32)
    if n_pad != n:
        xf = jnp.pad(xf, (0, n_pad - n))   # single pad op; skipped when batch tiles evenly
    x2 = xf.reshape(rows_p, bc)            # lane-dense batch layout

    p_packed = _pack_params(params)

    blk = pl.BlockSpec((br, bc), lambda i: (i, 0))

    cost = pl.CostEstimate(flops=82 * n_pad,
                           transcendentals=20 * n_pad,
                           bytes_accessed=12 * n_pad)

    y1_2d, y2_2d = pl.pallas_call(
        _two_mlp_kernel,
        out_shape=(jax.ShapeDtypeStruct((rows_p, bc), jnp.float32),
                   jax.ShapeDtypeStruct((rows_p, bc), jnp.float32)),
        grid=(nb,),
        in_specs=[
            pl.BlockSpec(memory_space=pltpu.MemorySpace.SMEM),  # packed params (tiny)
            blk,                                                # x tile
        ],
        out_specs=(blk, blk),
        compiler_params=pltpu.CompilerParams(
            dimension_semantics=("parallel",)),
        cost_estimate=cost,
    )(p_packed, x2)

    if n_pad != n:
        y1 = y1_2d.reshape(-1)[:n].reshape(n, 1)
        y2 = y2_2d.reshape(-1)[:n].reshape(n, 1)
    else:
        y1 = y1_2d.reshape(n, 1)
        y2 = y2_2d.reshape(n, 1)
    return y1, y2


def init_params(key):
    """Deterministic PyTorch-Linear-style init (uniform(-1/sqrt(fan_in), +))."""
    ks = jax.random.split(key, 8)

    def lin(kw, kb, fan_in, fan_out):
        bound = 1.0 / math.sqrt(fan_in)
        w = jax.random.uniform(kw, (fan_in, fan_out), jnp.float32, -bound, bound)
        b = jax.random.uniform(kb, (1, fan_out), jnp.float32, -bound, bound)
        return w, b

    w1a, b1a = lin(ks[0], ks[1], 1, _HID)
    w2a, b2a = lin(ks[2], ks[3], _HID, 1)
    w1b, b1b = lin(ks[4], ks[5], 1, _HID)
    w2b, b2b = lin(ks[6], ks[7], _HID, 1)
    return dict(w1a=w1a, b1a=b1a, w2a=w2a, b2a=b2a,
                w1b=w1b, b1b=b1b, w2b=w2b, b2b=b2b)


def reference_forward(x, p):
    h1 = jnp.tanh(x @ p["w1a"] + p["b1a"])
    y1 = h1 @ p["w2a"] + p["b2a"]
    h2 = jnp.tanh(x @ p["w1b"] + p["b1b"])
    y2 = h2 @ p["w2b"] + p["b2b"]
    return y1, y2


if __name__ == "__main__":
    key = jax.random.PRNGKey(0)
    kx, kp = jax.random.split(key)
    params = init_params(kp)

    # Small batch of scalar samples (matches nn.Linear(1, 10) input shape).
    n = 8
    x = jax.random.normal(kx, (n, 1), jnp.float32)
    y1, y2 = two_mlp_forward(x, params)
    jax.block_until_ready((y1, y2))

    r1, r2 = reference_forward(x, params)
    assert y1.shape == (n, 1) and y2.shape == (n, 1)
    assert jnp.allclose(y1, r1, atol=1e-5, rtol=1e-5), "ann1 mismatch (small batch)"
    assert jnp.allclose(y2, r2, atol=1e-5, rtol=1e-5), "ann2 mismatch (small batch)"

    # Mid-size batch: now a single (8, 512) block -> one grid step (was 3 tiny steps).
    n2 = 3000
    xl = jax.random.normal(jax.random.PRNGKey(1), (n2, 1), jnp.float32)
    z1, z2 = two_mlp_forward(xl, params)
    jax.block_until_ready((z1, z2))

    s1, s2 = reference_forward(xl, params)
    assert jnp.allclose(z1, s1, atol=1e-5, rtol=1e-5), "ann1 mismatch (single-block batch)"
    assert jnp.allclose(z2, s2, atol=1e-5, rtol=1e-5), "ann2 mismatch (single-block batch)"

    # Large batch exercising the multi-block parallel grid AND the no-pad fast path
    # (524288 = 4 blocks of (256, 512), even block count for v7x's two TCs).
    n3 = 512 * 1024
    xb = jax.random.normal(jax.random.PRNGKey(2), (n3, 1), jnp.float32)
    w1, w2 = two_mlp_forward(xb, params)
    jax.block_until_ready((w1, w2))

    t1, t2 = reference_forward(xb, params)
    assert jnp.allclose(w1, t1, atol=1e-5, rtol=1e-5), "ann1 mismatch (multi-block batch)"
    assert jnp.allclose(w2, t2, atol=1e-5, rtol=1e-5), "ann2 mismatch (multi-block batch)"

    print("KERNEL_OK")
</pallas_src>

<mosaic_0001>
module attributes {stable_mosaic.version = 11 : i64} {
  func.func @_two_mlp_kernel(%arg0: i32, %arg1: memref<64xf32, #tpu.memory_space<smem>>, %arg2: memref<8x512xf32, #tpu.memory_space<vmem>>, %arg3: memref<8x512xf32, #tpu.memory_space<vmem>>, %arg4: memref<8x512xf32, #tpu.memory_space<vmem>>) attributes {dimension_semantics = [#tpu.dimension_semantics<parallel>], iteration_bounds = array<i64: 1>, scalar_prefetch = 0 : i64, scratch_operands = 0 : i64, tpu.core_type = #tpu.core_type<tc>, window_params = [{transform_indices = @transform_0, window_bounds = array<i64: 64>}, {transform_indices = @transform_1, window_bounds = array<i64: 8, 512>}, {transform_indices = @transform_2, window_bounds = array<i64: 8, 512>}, {transform_indices = @transform_3, window_bounds = array<i64: 8, 512>}]} {
    %c0 = arith.constant 0 : index
    %c0_0 = arith.constant 0 : index
    %0 = vector.load %arg2[%c0, %c0_0] : memref<8x512xf32, #tpu.memory_space<vmem>>, vector<8x512xf32>
    %c60 = arith.constant 60 : index
    %1 = memref.load %arg1[%c60] : memref<64xf32, #tpu.memory_space<smem>>
    %2 = vector.broadcast %1 : f32 to vector<8x512xf32>
    %cst = arith.constant 0.000000e+00 : f32
    %3 = vector.broadcast %cst : f32 to vector<8x512xf32>
    %c0_1 = arith.constant 0 : index
    %4 = memref.load %arg1[%c0_1] : memref<64xf32, #tpu.memory_space<smem>>
    %5 = vector.broadcast %4 : f32 to vector<8x512xf32>
    %6 = arith.mulf %0, %5 : vector<8x512xf32>
    %c10 = arith.constant 10 : index
    %7 = memref.load %arg1[%c10] : memref<64xf32, #tpu.memory_space<smem>>
    %8 = vector.broadcast %7 : f32 to vector<8x512xf32>
    %9 = arith.addf %6, %8 : vector<8x512xf32>
    %10 = math.tanh %9 : vector<8x512xf32>
    %c20 = arith.constant 20 : index
    %11 = memref.load %arg1[%c20] : memref<64xf32, #tpu.memory_space<smem>>
    %12 = vector.broadcast %11 : f32 to vector<8x512xf32>
    %13 = arith.mulf %10, %12 : vector<8x512xf32>
    %14 = arith.addf %2, %13 : vector<8x512xf32>
    %c1 = arith.constant 1 : index
    %15 = memref.load %arg1[%c1] : memref<64xf32, #tpu.memory_space<smem>>
    %16 = vector.broadcast %15 : f32 to vector<8x512xf32>
    %17 = arith.mulf %0, %16 : vector<8x512xf32>
    %c11 = arith.constant 11 : index
    %18 = memref.load %arg1[%c11] : memref<64xf32, #tpu.memory_space<smem>>
    %19 = vector.broadcast %18 : f32 to vector<8x512xf32>
    %20 = arith.addf %17, %19 : vector<8x512xf32>
    %21 = math.tanh %20 : vector<8x512xf32>
    %c21 = arith.constant 21 : index
    %22 = memref.load %arg1[%c21] : memref<64xf32, #tpu.memory_space<smem>>
    %23 = vector.broadcast %22 : f32 to vector<8x512xf32>
    %24 = arith.mulf %21, %23 : vector<8x512xf32>
    %25 = arith.addf %3, %24 : vector<8x512xf32>
    %c2 = arith.constant 2 : index
    %26 = memref.load %arg1[%c2] : memref<64xf32, #tpu.memory_space<smem>>
    %27 = vector.broadcast %26 : f32 to vector<8x512xf32>
    %28 = arith.mulf %0, %27 : vector<8x512xf32>
    %c12 = arith.constant 12 : index
    %29 = memref.load %arg1[%c12] : memref<64xf32, #tpu.memory_space<smem>>
    %30 = vector.broadcast %29 : f32 to vector<8x512xf32>
    %31 = arith.addf %28, %30 : vector<8x512xf32>
    %32 = math.tanh %31 : vector<8x512xf32>
    %c22 = arith.constant 22 : index
    %33 = memref.load %arg1[%c22] : memref<64xf32, #tpu.memory_space<smem>>
    %34 = vector.broadcast %33 : f32 to vector<8x512xf32>
    %35 = arith.mulf %32, %34 : vector<8x512xf32>
    %36 = arith.addf %14, %35 : vector<8x512xf32>
    %c3 = arith.constant 3 : index
    %37 = memref.load %arg1[%c3] : memref<64xf32, #tpu.memory_space<smem>>
    %38 = vector.broadcast %37 : f32 to vector<8x512xf32>
    %39 = arith.mulf %0, %38 : vector<8x512xf32>
    %c13 = arith.constant 13 : index
    %40 = memref.load %arg1[%c13] : memref<64xf32, #tpu.memory_space<smem>>
    %41 = vector.broadcast %40 : f32 to vector<8x512xf32>
    %42 = arith.addf %39, %41 : vector<8x512xf32>
    %43 = math.tanh %42 : vector<8x512xf32>
    %c23 = arith.constant 23 : index
    %44 = memref.load %arg1[%c23] : memref<64xf32, #tpu.memory_space<smem>>
    %45 = vector.broadcast %44 : f32 to vector<8x512xf32>
    %46 = arith.mulf %43, %45 : vector<8x512xf32>
    %47 = arith.addf %25, %46 : vector<8x512xf32>
    %c4 = arith.constant 4 : index
    %48 = memref.load %arg1[%c4] : memref<64xf32, #tpu.memory_space<smem>>
    %49 = vector.broadcast %48 : f32 to vector<8x512xf32>
    %50 = arith.mulf %0, %49 : vector<8x512xf32>
    %c14 = arith.constant 14 : index
    %51 = memref.load %arg1[%c14] : memref<64xf32, #tpu.memory_space<smem>>
    %52 = vector.broadcast %51 : f32 to vector<8x512xf32>
    %53 = arith.addf %50, %52 : vector<8x512xf32>
    %54 = math.tanh %53 : vector<8x512xf32>
    %c24 = arith.constant 24 : index
    %55 = memref.load %arg1[%c24] : memref<64xf32, #tpu.memory_space<smem>>
    %56 = vector.broadcast %55 : f32 to vector<8x512xf32>
    %57 = arith.mulf %54, %56 : vector<8x512xf32>
    %58 = arith.addf %36, %57 : vector<8x512xf32>
    %c5 = arith.constant 5 : index
    %59 = memref.load %arg1[%c5] : memref<64xf32, #tpu.memory_space<smem>>
    %60 = vector.broadcast %59 : f32 to vector<8x512xf32>
    %61 = arith.mulf %0, %60 : vector<8x512xf32>
    %c15 = arith.constant 15 : index
    %62 = memref.load %arg1[%c15] : memref<64xf32, #tpu.memory_space<smem>>
    %63 = vector.broadcast %62 : f32 to vector<8x512xf32>
    %64 = arith.addf %61, %63 : vector<8x512xf32>
    %65 = math.tanh %64 : vector<8x512xf32>
    %c25 = arith.constant 25 : index
    %66 = memref.load %arg1[%c25] : memref<64xf32, #tpu.memory_space<smem>>
    %67 = vector.broadcast %66 : f32 to vector<8x512xf32>
    %68 = arith.mulf %65, %67 : vector<8x512xf32>
    %69 = arith.addf %47, %68 : vector<8x512xf32>
    %c6 = arith.constant 6 : index
    %70 = memref.load %arg1[%c6] : memref<64xf32, #tpu.memory_space<smem>>
    %71 = vector.broadcast %70 : f32 to vector<8x512xf32>
    %72 = arith.mulf %0, %71 : vector<8x512xf32>
    %c16 = arith.constant 16 : index
    %73 = memref.load %arg1[%c16] : memref<64xf32, #tpu.memory_space<smem>>
    %74 = vector.broadcast %73 : f32 to vector<8x512xf32>
    %75 = arith.addf %72, %74 : vector<8x512xf32>
    %76 = math.tanh %75 : vector<8x512xf32>
    %c26 = arith.constant 26 : index
    %77 = memref.load %arg1[%c26] : memref<64xf32, #tpu.memory_space<smem>>
    %78 = vector.broadcast %77 : f32 to vector<8x512xf32>
    %79 = arith.mulf %76, %78 : vector<8x512xf32>
    %80 = arith.addf %58, %79 : vector<8x512xf32>
    %c7 = arith.constant 7 : index
    %81 = memref.load %arg1[%c7] : memref<64xf32, #tpu.memory_space<smem>>
    %82 = vector.broadcast %81 : f32 to vector<8x512xf32>
    %83 = arith.mulf %0, %82 : vector<8x512xf32>
    %c17 = arith.constant 17 : index
    %84 = memref.load %arg1[%c17] : memref<64xf32, #tpu.memory_space<smem>>
    %85 = vector.broadcast %84 : f32 to vector<8x512xf32>
    %86 = arith.addf %83, %85 : vector<8x512xf32>
    %87 = math.tanh %86 : vector<8x512xf32>
    %c27 = arith.constant 27 : index
    %88 = memref.load %arg1[%c27] : memref<64xf32, #tpu.memory_space<smem>>
    %89 = vector.broadcast %88 : f32 to vector<8x512xf32>
    %90 = arith.mulf %87, %89 : vector<8x512xf32>
    %91 = arith.addf %69, %90 : vector<8x512xf32>
    %c8 = arith.constant 8 : index
    %92 = memref.load %arg1[%c8] : memref<64xf32, #tpu.memory_space<smem>>
    %93 = vector.broadcast %92 : f32 to vector<8x512xf32>
    %94 = arith.mulf %0, %93 : vector<8x512xf32>
    %c18 = arith.constant 18 : index
    %95 = memref.load %arg1[%c18] : memref<64xf32, #tpu.memory_space<smem>>
    %96 = vector.broadcast %95 : f32 to vector<8x512xf32>
    %97 = arith.addf %94, %96 : vector<8x512xf32>
    %98 = math.tanh %97 : vector<8x512xf32>
    %c28 = arith.constant 28 : index
    %99 = memref.load %arg1[%c28] : memref<64xf32, #tpu.memory_space<smem>>
    %100 = vector.broadcast %99 : f32 to vector<8x512xf32>
    %101 = arith.mulf %98, %100 : vector<8x512xf32>
    %102 = arith.addf %80, %101 : vector<8x512xf32>
    %c9 = arith.constant 9 : index
    %103 = memref.load %arg1[%c9] : memref<64xf32, #tpu.memory_space<smem>>
    %104 = vector.broadcast %103 : f32 to vector<8x512xf32>
    %105 = arith.mulf %0, %104 : vector<8x512xf32>
    %c19 = arith.constant 19 : index
    %106 = memref.load %arg1[%c19] : memref<64xf32, #tpu.memory_space<smem>>
    %107 = vector.broadcast %106 : f32 to vector<8x512xf32>
    %108 = arith.addf %105, %107 : vector<8x512xf32>
    %109 = math.tanh %108 : vector<8x512xf32>
    %c29 = arith.constant 29 : index
    %110 = memref.load %arg1[%c29] : memref<64xf32, #tpu.memory_space<smem>>
    %111 = vector.broadcast %110 : f32 to vector<8x512xf32>
    %112 = arith.mulf %109, %111 : vector<8x512xf32>
    %113 = arith.addf %91, %112 : vector<8x512xf32>
    %114 = arith.addf %102, %113 : vector<8x512xf32>
    %c0_2 = arith.constant 0 : index
    %c0_3 = arith.constant 0 : index
    %115 = vector.load %arg3[%c0_2, %c0_3] : memref<8x512xf32, #tpu.memory_space<vmem>>, vector<8x512xf32>
    tpu.vector_store %arg3[%c0_2, %c0_3], %114 {strides = array<i32>} : memref<8x512xf32, #tpu.memory_space<vmem>>, vector<8x512xf32>,
    %c61 = arith.constant 61 : index
    %116 = memref.load %arg1[%c61] : memref<64xf32, #tpu.memory_space<smem>>
    %117 = vector.broadcast %116 : f32 to vector<8x512xf32>
    %cst_4 = arith.constant 0.000000e+00 : f32
    %118 = vector.broadcast %cst_4 : f32 to vector<8x512xf32>
    %c30 = arith.constant 30 : index
    %119 = memref.load %arg1[%c30] : memref<64xf32, #tpu.memory_space<smem>>
    %120 = vector.broadcast %119 : f32 to vector<8x512xf32>
    %121 = arith.mulf %0, %120 : vector<8x512xf32>
    %c40 = arith.constant 40 : index
    %122 = memref.load %arg1[%c40] : memref<64xf32, #tpu.memory_space<smem>>
    %123 = vector.broadcast %122 : f32 to vector<8x512xf32>
    %124 = arith.addf %121, %123 : vector<8x512xf32>
    %125 = math.tanh %124 : vector<8x512xf32>
    %c50 = arith.constant 50 : index
    %126 = memref.load %arg1[%c50] : memref<64xf32, #tpu.memory_space<smem>>
    %127 = vector.broadcast %126 : f32 to vector<8x512xf32>
    %128 = arith.mulf %125, %127 : vector<8x512xf32>
    %129 = arith.addf %117, %128 : vector<8x512xf32>
    %c31 = arith.constant 31 : index
    %130 = memref.load %arg1[%c31] : memref<64xf32, #tpu.memory_space<smem>>
    %131 = vector.broadcast %130 : f32 to vector<8x512xf32>
    %132 = arith.mulf %0, %131 : vector<8x512xf32>
    %c41 = arith.constant 41 : index
    %133 = memref.load %arg1[%c41] : memref<64xf32, #tpu.memory_space<smem>>
    %134 = vector.broadcast %133 : f32 to vector<8x512xf32>
    %135 = arith.addf %132, %134 : vector<8x512xf32>
    %136 = math.tanh %135 : vector<8x512xf32>
    %c51 = arith.constant 51 : index
    %137 = memref.load %arg1[%c51] : memref<64xf32, #tpu.memory_space<smem>>
    %138 = vector.broadcast %137 : f32 to vector<8x512xf32>
    %139 = arith.mulf %136, %138 : vector<8x512xf32>
    %140 = arith.addf %118, %139 : vector<8x512xf32>
    %c32 = arith.constant 32 : index
    %141 = memref.load %arg1[%c32] : memref<64xf32, #tpu.memory_space<smem>>
    %142 = vector.broadcast %141 : f32 to vector<8x512xf32>
    %143 = arith.mulf %0, %142 : vector<8x512xf32>
    %c42 = arith.constant 42 : index
    %144 = memref.load %arg1[%c42] : memref<64xf32, #tpu.memory_space<smem>>
    %145 = vector.broadcast %144 : f32 to vector<8x512xf32>
    %146 = arith.addf %143, %145 : vector<8x512xf32>
    %147 = math.tanh %146 : vector<8x512xf32>
    %c52 = arith.constant 52 : index
    %148 = memref.load %arg1[%c52] : memref<64xf32, #tpu.memory_space<smem>>
    %149 = vector.broadcast %148 : f32 to vector<8x512xf32>
    %150 = arith.mulf %147, %149 : vector<8x512xf32>
    %151 = arith.addf %129, %150 : vector<8x512xf32>
    %c33 = arith.constant 33 : index
    %152 = memref.load %arg1[%c33] : memref<64xf32, #tpu.memory_space<smem>>
    %153 = vector.broadcast %152 : f32 to vector<8x512xf32>
    %154 = arith.mulf %0, %153 : vector<8x512xf32>
    %c43 = arith.constant 43 : index
    %155 = memref.load %arg1[%c43] : memref<64xf32, #tpu.memory_space<smem>>
    %156 = vector.broadcast %155 : f32 to vector<8x512xf32>
    %157 = arith.addf %154, %156 : vector<8x512xf32>
    %158 = math.tanh %157 : vector<8x512xf32>
    %c53 = arith.constant 53 : index
    %159 = memref.load %arg1[%c53] : memref<64xf32, #tpu.memory_space<smem>>
    %160 = vector.broadcast %159 : f32 to vector<8x512xf32>
    %161 = arith.mulf %158, %160 : vector<8x512xf32>
    %162 = arith.addf %140, %161 : vector<8x512xf32>
    %c34 = arith.constant 34 : index
    %163 = memref.load %arg1[%c34] : memref<64xf32, #tpu.memory_space<smem>>
    %164 = vector.broadcast %163 : f32 to vector<8x512xf32>
    %165 = arith.mulf %0, %164 : vector<8x512xf32>
    %c44 = arith.constant 44 : index
    %166 = memref.load %arg1[%c44] : memref<64xf32, #tpu.memory_space<smem>>
    %167 = vector.broadcast %166 : f32 to vector<8x512xf32>
    %168 = arith.addf %165, %167 : vector<8x512xf32>
    %169 = math.tanh %168 : vector<8x512xf32>
    %c54 = arith.constant 54 : index
    %170 = memref.load %arg1[%c54] : memref<64xf32, #tpu.memory_space<smem>>
    %171 = vector.broadcast %170 : f32 to vector<8x512xf32>
    %172 = arith.mulf %169, %171 : vector<8x512xf32>
    %173 = arith.addf %151, %172 : vector<8x512xf32>
    %c35 = arith.constant 35 : index
    %174 = memref.load %arg1[%c35] : memref<64xf32, #tpu.memory_space<smem>>
    %175 = vector.broadcast %174 : f32 to vector<8x512xf32>
    %176 = arith.mulf %0, %175 : vector<8x512xf32>
    %c45 = arith.constant 45 : index
    %177 = memref.load %arg1[%c45] : memref<64xf32, #tpu.memory_space<smem>>
    %178 = vector.broadcast %177 : f32 to vector<8x512xf32>
    %179 = arith.addf %176, %178 : vector<8x512xf32>
    %180 = math.tanh %179 : vector<8x512xf32>
    %c55 = arith.constant 55 : index
    %181 = memref.load %arg1[%c55] : memref<64xf32, #tpu.memory_space<smem>>
    %182 = vector.broadcast %181 : f32 to vector<8x512xf32>
    %183 = arith.mulf %180, %182 : vector<8x512xf32>
    %184 = arith.addf %162, %183 : vector<8x512xf32>
    %c36 = arith.constant 36 : index
    %185 = memref.load %arg1[%c36] : memref<64xf32, #tpu.memory_space<smem>>
    %186 = vector.broadcast %185 : f32 to vector<8x512xf32>
    %187 = arith.mulf %0, %186 : vector<8x512xf32>
    %c46 = arith.constant 46 : index
    %188 = memref.load %arg1[%c46] : memref<64xf32, #tpu.memory_space<smem>>
    %189 = vector.broadcast %188 : f32 to vector<8x512xf32>
    %190 = arith.addf %187, %189 : vector<8x512xf32>
    %191 = math.tanh %190 : vector<8x512xf32>
    %c56 = arith.constant 56 : index
    %192 = memref.load %arg1[%c56] : memref<64xf32, #tpu.memory_space<smem>>
    %193 = vector.broadcast %192 : f32 to vector<8x512xf32>
    %194 = arith.mulf %191, %193 : vector<8x512xf32>
    %195 = arith.addf %173, %194 : vector<8x512xf32>
    %c37 = arith.constant 37 : index
    %196 = memref.load %arg1[%c37] : memref<64xf32, #tpu.memory_space<smem>>
    %197 = vector.broadcast %196 : f32 to vector<8x512xf32>
    %198 = arith.mulf %0, %197 : vector<8x512xf32>
    %c47 = arith.constant 47 : index
    %199 = memref.load %arg1[%c47] : memref<64xf32, #tpu.memory_space<smem>>
    %200 = vector.broadcast %199 : f32 to vector<8x512xf32>
    %201 = arith.addf %198, %200 : vector<8x512xf32>
    %202 = math.tanh %201 : vector<8x512xf32>
    %c57 = arith.constant 57 : index
    %203 = memref.load %arg1[%c57] : memref<64xf32, #tpu.memory_space<smem>>
    %204 = vector.broadcast %203 : f32 to vector<8x512xf32>
    %205 = arith.mulf %202, %204 : vector<8x512xf32>
    %206 = arith.addf %184, %205 : vector<8x512xf32>
    %c38 = arith.constant 38 : index
    %207 = memref.load %arg1[%c38] : memref<64xf32, #tpu.memory_space<smem>>
    %208 = vector.broadcast %207 : f32 to vector<8x512xf32>
    %209 = arith.mulf %0, %208 : vector<8x512xf32>
    %c48 = arith.constant 48 : index
    %210 = memref.load %arg1[%c48] : memref<64xf32, #tpu.memory_space<smem>>
    %211 = vector.broadcast %210 : f32 to vector<8x512xf32>
    %212 = arith.addf %209, %211 : vector<8x512xf32>
    %213 = math.tanh %212 : vector<8x512xf32>
    %c58 = arith.constant 58 : index
    %214 = memref.load %arg1[%c58] : memref<64xf32, #tpu.memory_space<smem>>
    %215 = vector.broadcast %214 : f32 to vector<8x512xf32>
    %216 = arith.mulf %213, %215 : vector<8x512xf32>
    %217 = arith.addf %195, %216 : vector<8x512xf32>
    %c39 = arith.constant 39 : index
    %218 = memref.load %arg1[%c39] : memref<64xf32, #tpu.memory_space<smem>>
    %219 = vector.broadcast %218 : f32 to vector<8x512xf32>
    %220 = arith.mulf %0, %219 : vector<8x512xf32>
    %c49 = arith.constant 49 : index
    %221 = memref.load %arg1[%c49] : memref<64xf32, #tpu.memory_space<smem>>
    %222 = vector.broadcast %221 : f32 to vector<8x512xf32>
    %223 = arith.addf %220, %222 : vector<8x512xf32>
    %224 = math.tanh %223 : vector<8x512xf32>
    %c59 = arith.constant 59 : index
    %225 = memref.load %arg1[%c59] : memref<64xf32, #tpu.memory_space<smem>>
    %226 = vector.broadcast %225 : f32 to vector<8x512xf32>
    %227 = arith.mulf %224, %226 : vector<8x512xf32>
    %228 = arith.addf %206, %227 : vector<8x512xf32>
    %229 = arith.addf %217, %228 : vector<8x512xf32>
    %c0_5 = arith.constant 0 : index
    %c0_6 = arith.constant 0 : index
    %230 = vector.load %arg4[%c0_5, %c0_6] : memref<8x512xf32, #tpu.memory_space<vmem>>, vector<8x512xf32>
    tpu.vector_store %arg4[%c0_5, %c0_6], %229 {strides = array<i32>} : memref<8x512xf32, #tpu.memory_space<vmem>>, vector<8x512xf32>,
    return
  }
  func.func @transform_0(%arg0: i32) -> i32 {
    %c0_i32 = arith.constant 0 : i32
    %c0_i32_0 = arith.constant 0 : i32
    return %c0_i32 : i32
  }
  func.func @transform_1(%arg0: i32) -> (i32, i32) {
    %c0_i32 = arith.constant 0 : i32
    %c0_i32_0 = arith.constant 0 : i32
    return %arg0, %c0_i32 : i32, i32
  }
  func.func @transform_2(%arg0: i32) -> (i32, i32) {
    %c0_i32 = arith.constant 0 : i32
    %c0_i32_0 = arith.constant 0 : i32
    return %arg0, %c0_i32 : i32, i32
  }
  func.func @transform_3(%arg0: i32) -> (i32, i32) {
    %c0_i32 = arith.constant 0 : i32
    %c0_i32_0 = arith.constant 0 : i32
    return %arg0, %c0_i32 : i32, i32
  }
}

</mosaic_0001>

<bundles_post_ra>
// kernel: tpu_custom_call.1
= control target key start
LH: loop header
LB: loop body
LE: loop exit
PB: predicated region body
PF: predicated region fallthrough
CT: control target
= control target key end

     0   :  { %9 = vsyncpa [#allocation5], 0  ;;  %s1527_s0 = inlined_call_operand.hbm [shape: f32[64], index: 0, kind: input, shape index: {}]   ;;  %s1528_s1 = inlined_call_operand.hbm [shape: f32[8,512], index: 1, kind: input, shape index: {}]   ;;  %s1529_s2 = inlined_call_operand.hbm [shape: f32[8,512], index: 2, kind: output, shape index: {0}]   ;;  %s1530_s3 = inlined_call_operand.hbm [shape: f32[8,512], index: 3, kind: output, shape index: {1}]  }
   0x1   :  { %10 = vsyncpa [#allocation3], 0 }
   0x2   :  { %11 = vsyncpa [#allocation4], 0 }
   0x3   :  { %12 = vsyncpa [#allocation9], 0  ;;  %s914_s12 = smov [#allocation2]   ;;  %s915_s15 = smov [#allocation6]  }
   0x4   :  { %20 = dma.hbm_to_smem %s1527_s0, 16, %s914_s12, [#allocation5]  }
   0x5   :  { %s27_s16 = sshll.u32 %s915_s15, 4  ;;  %s28_s16 = int_to_ptr.vmem [resolvable:$true] %s27_s16 }
   0x6   :  { %s854_s17 = scalar_lea.vmem %s28_s16, 512  ;;  %p859_p1 = scmp.lt.s32.totalorder %s28_s16, %s28_s16 }
   0x7   :  { %p855_p0 = scmp.ne.s32.totalorder %s28_s16, %s854_s17  ;;  %p860_p2 = scmp.lt.s32.totalorder %s854_s17, %s854_s17 }
   0x9   :  { %p861_p3 = por %p860_p2, %p859_p1 }
   0xb   :  { %p862_p4 = pnand %p861_p3, %p855_p0 }
   0xd   :  { %865 = shalt.err (!%p862_p4)
}
   0xe   :  { %30 = dma.hbm_to_vmem [thread:$0]  %s1528_s1, 512, %s28_s16, [#allocation3]  }
   0xf   :  { %906 = dma.done.wait [#allocation5], 16  }
  0x10   :  { %907 = vsyncadd [#allocation5], 4294967280 }
  0x11   :  { %908 = dma.done.wait [#allocation3], 512  }
  0x12   :  { %909 = vsyncadd [#allocation3], 4294966784 }
  0x13   :  { %37 = sfence }
  0x14   :  { %s612_s0 = sld [smem:[#allocation2 + $0x3c]]  ;;  %v944_v0 = vld [vmem:[#allocation6] sm:$0xff]  ;;  %v946_v1 = vld [vmem:[#allocation6 + $0x8] sm:$0xff]  ;;  %v948_v2 = vld [vmem:[#allocation6 + $0x10] sm:$0xff] }
  0x15   :  { %s44_s20 = sld [smem:[#allocation2]]  ;;  %v950_v3 = vld [vmem:[#allocation6 + $0x18] sm:$0xff] }
  0x16   :  { %s613_s21 = sld [smem:[#allocation2 + $0xa]] }
  0x17   :  { %s614_s22 = sld [smem:[#allocation2 + $0x14]] }
  0x18   :  { %s615_s23 = sld [smem:[#allocation2 + $0x1]] }
  0x19   :  { %s616_s24 = sld [smem:[#allocation2 + $0xb]] }
  0x1a   :  { %s617_s25 = sld [smem:[#allocation2 + $0x15]]  ;;  %v955_v9 = vstv %s612_s0 }
  0x1b   :  { %v45_v4 = vstv %s44_s20  ;;  %s618_s1 = sld [smem:[#allocation2 + $0x2]] }
  0x1c   :  { %v46_v5 = vmul.f32 %v45_v4, %v944_v0  ;;  %v51_v6 = vstv %s613_s21  ;;  %s619_s26 = sld [smem:[#allocation2 + $0xc]]  ;;  %v47_v7 = vmul.f32 %v45_v4, %v946_v1  ;;  %v48_v8 = vmul.f32 %v45_v4, %v948_v2 }
  0x1d   :  { %v957_v10 = vstv %s614_s22  ;;  %s620_s27 = sld [smem:[#allocation2 + $0x16]]  ;;  %v49_v11 = vmul.f32 %v45_v4, %v950_v3 }
  0x1e   :  { %v52_v12 = vadd.f32 %v51_v6, %v46_v5  ;;  %v71_v13 = vstv %s615_s23  ;;  %s621_s28 = sld [smem:[#allocation2 + $0x3]]  ;;  %v53_v14 = vadd.f32 %v51_v6, %v47_v7  ;;  %v54_v15 = vadd.f32 %v51_v6, %v48_v8 }
  0x1f   :  { %v72_v16 = vmul.f32 %v71_v13, %v944_v0  ;;  %v961_v17 = vstv %s616_s24  ;;  %s622_s29 = sld [smem:[#allocation2 + $0xd]]  ;;  %v73_v18 = vmul.f32 %v71_v13, %v946_v1  ;;  %v74_v19 = vmul.f32 %v71_v13, %v948_v2 }
  0x20   :  { %677 = vtanh.f32 %v52_v12  ;;  %v965_v20 = vstv %s617_s25  ;;  %s623_s30 = sld [smem:[#allocation2 + $0x17]]  ;;  %v967_v21 = vadd.f32 %v51_v6, %v49_v11  ;;  %v970_v22 = vmul.f32 %v71_v13, %v950_v3 }
  0x21   :  { %v78_v23 = vadd.f32 %v961_v17, %v72_v16  ;;  %v973_v24 = vstv %s618_s1  ;;  %s624_s4 = sld [smem:[#allocation2 + $0x4]]  ;;  %679 = vtanh.f32 %v53_v14  ;;  %v79_v25 = vadd.f32 %v961_v17, %v73_v18 }
  0x22   :  { %v98_v26 = vmul.f32 %v973_v24, %v944_v0  ;;  %v978_v27 = vstv %s619_s26  ;;  %s625_s5 = sld [smem:[#allocation2 + $0xe]]  ;;  %v99_v28 = vmul.f32 %v973_v24, %v946_v1  ;;  %681 = vtanh.f32 %v54_v15 }
  0x23   :  { %683 = vtanh.f32 %v78_v23  ;;  %v982_v29 = vstv %s620_s27  ;;  %s626_s6 = sld [smem:[#allocation2 + $0x18]]  ;;  %v80_v30 = vadd.f32 %v961_v17, %v74_v19  ;;  %v100_v31 = vmul.f32 %v973_v24, %v948_v2 }
  0x24   :  { %v104_v32 = vadd.f32 %v978_v27, %v98_v26  ;;  %v988_v33 = vstv %s621_s28  ;;  %s627_s7 = sld [smem:[#allocation2 + $0x5]]  ;;  %685 = vtanh.f32 %v79_v25  ;;  %v105_v34 = vadd.f32 %v978_v27, %v99_v28 }
  0x25   :  { %v124_v35 = vmul.f32 %v988_v33, %v944_v0  ;;  %v993_v36 = vstv %s622_s29  ;;  %s628_s8 = sld [smem:[#allocation2 + $0xf]]  ;;  %v125_v37 = vmul.f32 %v988_v33, %v946_v1  ;;  %687 = vtanh.f32 %v80_v30 }
  0x26   :  { %689 = vtanh.f32 %v104_v32  ;;  %v997_v38 = vstv %s623_s30  ;;  %s629_s9 = sld [smem:[#allocation2 + $0x19]]  ;;  %v106_v39 = vadd.f32 %v978_v27, %v100_v31  ;;  %v126_v40 = vmul.f32 %v988_v33, %v948_v2 }
  0x27   :  { %v130_v41 = vadd.f32 %v993_v36, %v124_v35  ;;  %v1003_v42 = vstv %s624_s4  ;;  %s630_s10 = sld [smem:[#allocation2 + $0x6]]  ;;  %691 = vtanh.f32 %v105_v34  ;;  %v131_v43 = vadd.f32 %v993_v36, %v125_v37 }
  0x28   :  { %v150_v44 = vmul.f32 %v1003_v42, %v944_v0  ;;  %v1008_v45 = vstv %s625_s5  ;;  %s1010_s11 = sld [smem:[#allocation2 + $0x10]]  ;;  %v151_v46 = vmul.f32 %v1003_v42, %v946_v1  ;;  %693 = vtanh.f32 %v106_v39 }
  0x29   :  { %695 = vtanh.f32 %v130_v41  ;;  %v1014_v47 = vstv %s626_s6  ;;  %s1016_s12 = sld [smem:[#allocation2 + $0x1a]]  ;;  %v132_v48 = vadd.f32 %v993_v36, %v126_v40  ;;  %v152_v49 = vmul.f32 %v1003_v42, %v948_v2 }
  0x2a   :  { %v156_v50 = vadd.f32 %v1008_v45, %v150_v44  ;;  %v1022_v51 = vstv %s627_s7  ;;  %s1024_s13 = sld [smem:[#allocation2 + $0x7]]  ;;  %697 = vtanh.f32 %v131_v43  ;;  %v157_v52 = vadd.f32 %v1008_v45, %v151_v46 }
  0x2b   :  { %v176_v53 = vmul.f32 %v1022_v51, %v944_v0  ;;  %v1029_v54 = vstv %s628_s8  ;;  %s1031_s14 = sld [smem:[#allocation2 + $0x11]]  ;;  %v177_v55 = vmul.f32 %v1022_v51, %v946_v1  ;;  %699 = vtanh.f32 %v132_v48 }
  0x2c   :  { %701 = vtanh.f32 %v156_v50  ;;  %v1035_v56 = vstv %s629_s9  ;;  %s1037_s15 = sld [smem:[#allocation2 + $0x1b]]  ;;  %v1040_v57 = vadd.f32 %v1008_v45, %v152_v49  ;;  %v178_v58 = vmul.f32 %v1022_v51, %v948_v2 }
  0x2d   :  { %v678_v59 = vpop.eup %677  ;;  %v182_v60 = vadd.f32 %v1029_v54, %v176_v53  ;;  %v1045_v61 = vstv %s630_s10  ;;  %s1047_s16 = sld [smem:[#allocation2 + $0x8]]  ;;  %703 = vtanh.f32 %v157_v52  ;;  %v183_v62 = vadd.f32 %v1029_v54, %v177_v55 }
  0x2e   :  { %v680_v63 = vpop.eup %679  ;;  %v62_v4 = vmul.f32 %v678_v59, %v957_v10  ;;  %v202_v5 = vmul.f32 %v1045_v61, %v944_v0  ;;  %v1054_v6 = vstv %s1010_s11  ;;  %s1056_s17 = sld [smem:[#allocation2 + $0x12]]  ;;  %v203_v7 = vmul.f32 %v1045_v61, %v946_v1 }
  0x2f   :  { %v682_v8 = vpop.eup %681  ;;  %705 = vtanh.f32 %v182_v60  ;;  %v1061_v11 = vstv %s1016_s12  ;;  %s1063_s18 = sld [smem:[#allocation2 + $0x1c]]  ;;  %v63_v12 = vmul.f32 %v680_v63, %v957_v10  ;;  %v1067_v13 = vadd.f32 %v1029_v54, %v178_v58 }
  0x30   :  { %v684_v14 = vpop.eup %683  ;;  %v66_v15 = vadd.f32 %v62_v4, %v955_v9  ;;  %v208_v16 = vadd.f32 %v1054_v6, %v202_v5  ;;  %v1072_v18 = vstv %s1024_s13  ;;  %s1074_s19 = sld [smem:[#allocation2 + $0x9]]  ;;  %707 = vtanh.f32 %v183_v62 }
  0x31   :  { %v686_v19 = vpop.eup %685  ;;  %v88_v23 = vmul.f32 %v684_v14, %v965_v20  ;;  %v228_v25 = vmul.f32 %v1072_v18, %v944_v0  ;;  %v1080_v26 = vstv %s1031_s14  ;;  %s1082_s0 = sld [smem:[#allocation2 + $0x13]]  ;;  %v67_v28 = vadd.f32 %v63_v12, %v955_v9 }
  0x32   :  { %v688_v30 = vpop.eup %687  ;;  %709 = vtanh.f32 %v208_v16  ;;  %v1086_v31 = vstv %s1037_s15  ;;  %s641_s20 = sld [smem:[#allocation2 + $0x1d]]  ;;  %v89_v32 = vmul.f32 %v686_v19, %v965_v20  ;;  %v209_v34 = vadd.f32 %v1054_v6, %v203_v7 }
  0x33   :  { %v690_v35 = vpop.eup %689  ;;  %v234_v37 = vadd.f32 %v1080_v26, %v228_v25  ;;  %v1092_v39 = vstv %s1047_s16  ;;  %v229_v40 = vmul.f32 %v1072_v18, %v946_v1  ;;  %v64_v41 = vmul.f32 %v682_v8, %v957_v10  ;;  %s1144_s21 = sld [smem:[#allocation2 + $0x3d]] }
  0x34   :  { %v692_v43 = vpop.eup %691  ;;  %v114_v44 = vmul.f32 %v690_v35, %v982_v29  ;;  %v254_v46 = vmul.f32 %v1092_v39, %v944_v0  ;;  %v1101_v48 = vstv %s1056_s17  ;;  %711 = vtanh.f32 %v209_v34  ;;  %s1151_s22 = sld [smem:[#allocation2 + $0x1e]] }
  0x35   :  { %v694_v49 = vpop.eup %693  ;;  %713 = vtanh.f32 %v234_v37  ;;  %v1104_v50 = vstv %s1063_s18  ;;  %v115_v52 = vmul.f32 %v692_v43, %v982_v29  ;;  %v235_v53 = vadd.f32 %v1080_v26, %v229_v40  ;;  %s1157_s23 = sld [smem:[#allocation2 + $0x28]] }
  0x36   :  { %v696_v55 = vpop.eup %695  ;;  %v118_v58 = vadd.f32 %v114_v44, %v66_v15  ;;  %v260_v59 = vadd.f32 %v1101_v48, %v254_v46  ;;  %v1110_v60 = vstv %s1074_s19  ;;  %v255_v62 = vmul.f32 %v1092_v39, %v946_v1  ;;  %s1163_s24 = sld [smem:[#allocation2 + $0x32]] }
  0x37   :  { %v698_v63 = vpop.eup %697  ;;  %v140_v4 = vmul.f32 %v696_v55, %v997_v38  ;;  %v280_v5 = vmul.f32 %v1110_v60, %v944_v0  ;;  %v1118_v7 = vstv %s1082_s0  ;;  %v119_v8 = vadd.f32 %v115_v52, %v67_v28  ;;  %s1169_s25 = sld [smem:[#allocation2 + $0x1f]] }
  0x38   :  { %v700_v12 = vpop.eup %699  ;;  %715 = vtanh.f32 %v260_v59  ;;  %v1120_v14 = vstv %s641_s20  ;;  %v141_v15 = vmul.f32 %v698_v63, %v997_v38  ;;  %v261_v16 = vadd.f32 %v1101_v48, %v255_v62  ;;  %s1176_s1 = sld [smem:[#allocation2 + $0x29]] }
  0x39   :  { %v702_v19 = vpop.eup %701  ;;  %v144_v25 = vadd.f32 %v140_v4, %v88_v23  ;;  %v286_v34 = vadd.f32 %v1118_v7, %v280_v5  ;;  %717 = vtanh.f32 %v235_v53  ;;  %v281_v35 = vmul.f32 %v1110_v60, %v946_v1  ;;  %s1181_s26 = sld [smem:[#allocation2 + $0x33]] }
  0x3a   :  { %v704_v37 = vpop.eup %703  ;;  %v166_v40 = vmul.f32 %v702_v19, %v1014_v47  ;;  %v145_v28 = vadd.f32 %v141_v15, %v89_v32  ;;  %719 = vtanh.f32 %v261_v16  ;;  %v68_v43 = vadd.f32 %v64_v41, %v955_v9  ;;  %s1185_s27 = sld [smem:[#allocation2 + $0x20]] }
  0x3b   :  { %721 = vtanh.f32 %v286_v34  ;;  %v167_v44 = vmul.f32 %v704_v37, %v1014_v47  ;;  %v287_v46 = vadd.f32 %v1118_v7, %v281_v35  ;;  %v90_v23 = vmul.f32 %v688_v30, %v965_v20  ;;  %s1191_s28 = sld [smem:[#allocation2 + $0x2a]] }
  0x3c   :  { %v706_v52 = vpop.eup %705  ;;  %v170_v55 = vadd.f32 %v166_v40, %v118_v58  ;;  %v116_v53 = vmul.f32 %v694_v49, %v982_v29  ;;  %v142_v59 = vmul.f32 %v700_v12, %v997_v38  ;;  %723 = vtanh.f32 %v1040_v57  ;;  %s1198_s29 = sld [smem:[#allocation2 + $0x34]] }
  0x3d   :  { %v708_v62 = vpop.eup %707  ;;  %v192_v32 = vmul.f32 %v706_v52, %v1035_v56  ;;  %v171_v63 = vadd.f32 %v167_v44, %v119_v8  ;;  %725 = vtanh.f32 %v287_v46  ;;  %v204_v41 = vmul.f32 %v1045_v61, %v948_v2  ;;  %s1202_s30 = sld [smem:[#allocation2 + $0x21]] }
  0x3e   :  { %v193_v4 = vmul.f32 %v708_v62, %v1035_v56  ;;  %v1139_v5 = vadd.f32 %v116_v53, %v68_v43  ;;  %v1141_v30 = vadd.f32 %v142_v59, %v90_v23  ;;  %727 = vtanh.f32 %v1067_v13  ;;  %s1206_s4 = sld [smem:[#allocation2 + $0x2b]] }
  0x3f   :  { %v710_v49 = vpop.eup %709  ;;  %v196_v57 = vadd.f32 %v192_v32, %v144_v25  ;;  %v210_v58 = vadd.f32 %v1054_v6, %v204_v41  ;;  %v230_v8 = vmul.f32 %v1072_v18, %v948_v2  ;;  %v256_v12 = vmul.f32 %v1092_v39, %v948_v2  ;;  %s1210_s5 = sld [smem:[#allocation2 + $0x35]] }
  0x40   :  { %v218_v15 = vmul.f32 %v710_v49, %v1061_v11  ;;  %v197_v16 = vadd.f32 %v193_v4, %v145_v28  ;;  %v282_v13 = vmul.f32 %v1110_v60, %v948_v2  ;;  %729 = vtanh.f32 %v967_v21  ;;  %s1215_s6 = sld [smem:[#allocation2 + $0x22]] }
  0x41   :  { %v712_v19 = vpop.eup %711  ;;  %731 = vtanh.f32 %v210_v58  ;;  %v236_v25 = vadd.f32 %v1080_v26, %v230_v8  ;;  %v262_v34 = vadd.f32 %v1101_v48, %v256_v12  ;;  %v81_v35 = vadd.f32 %v961_v17, %v970_v22  ;;  %s1222_s7 = sld [smem:[#allocation2 + $0x2c]] }
  0x42   :  { %v714_v37 = vpop.eup %713  ;;  %v222_v40 = vadd.f32 %v218_v15, %v170_v55  ;;  %v219_v28 = vmul.f32 %v712_v19, %v1061_v11  ;;  %v288_v43 = vadd.f32 %v1118_v7, %v282_v13  ;;  %v101_v21 = vmul.f32 %v973_v24, %v950_v3  ;;  %s1225_s8 = sld [smem:[#allocation2 + $0x36]] }
  0x43   :  { %v244_v44 = vmul.f32 %v714_v37, %v1086_v31  ;;  %733 = vtanh.f32 %v236_v25  ;;  %v127_v46 = vmul.f32 %v988_v33, %v950_v3  ;;  %v153_v17 = vmul.f32 %v1003_v42, %v950_v3  ;;  %s1235_s9 = sld [smem:[#allocation2 + $0x23]] }
  0x44   :  { %v223_v22 = vadd.f32 %v219_v28, %v171_v63  ;;  %735 = vtanh.f32 %v262_v34  ;;  %v107_v23 = vadd.f32 %v978_v27, %v101_v21  ;;  %v179_v24 = vmul.f32 %v1022_v51, %v950_v3  ;;  %s1240_s10 = sld [smem:[#allocation2 + $0x2d]] }
  0x45   :  { %v716_v52 = vpop.eup %715  ;;  %v248_v55 = vadd.f32 %v244_v44, %v196_v57  ;;  %737 = vtanh.f32 %v288_v43  ;;  %v133_v53 = vadd.f32 %v993_v36, %v127_v46  ;;  %v159_v33 = vadd.f32 %v1008_v45, %v153_v17  ;;  %s1252_s11 = sld [smem:[#allocation2 + $0x37]] }
  0x46   :  { %v718_v42 = vpop.eup %717  ;;  %v270_v59 = vmul.f32 %v716_v52, %v1104_v50  ;;  %739 = vtanh.f32 %v81_v35  ;;  %v185_v27 = vadd.f32 %v1029_v54, %v179_v24  ;;  %v205_v51 = vmul.f32 %v1045_v61, %v950_v3  ;;  %s1258_s12 = sld [smem:[#allocation2 + $0x24]] }
  0x47   :  { %v720_v62 = vpop.eup %719  ;;  %v245_v32 = vmul.f32 %v718_v42, %v1086_v31  ;;  %741 = vtanh.f32 %v107_v23  ;;  %v231_v36 = vmul.f32 %v1072_v18, %v950_v3  ;;  %v257_v45 = vmul.f32 %v1092_v39, %v950_v3  ;;  %s1270_s13 = sld [smem:[#allocation2 + $0x2e]] }
  0x48   :  { %v722_v63 = vpop.eup %721  ;;  %v274_v41 = vadd.f32 %v270_v59, %v222_v40  ;;  %v271_v54 = vmul.f32 %v720_v62, %v1104_v50  ;;  %743 = vtanh.f32 %v133_v53  ;;  %v211_v61 = vadd.f32 %v1054_v6, %v205_v51  ;;  %s1274_s14 = sld [smem:[#allocation2 + $0x38]] }
  0x49   :  { %v724_v4 = vpop.eup %723  ;;  %v296_v49 = vmul.f32 %v722_v63, %v1120_v14  ;;  %v249_v57 = vadd.f32 %v245_v32, %v197_v16  ;;  %745 = vtanh.f32 %v159_v33  ;;  %v237_v18 = vadd.f32 %v1080_v26, %v231_v36  ;;  %s1282_s15 = sld [smem:[#allocation2 + $0x25]] }
  0x4a   :  { %v726_v39 = vpop.eup %725  ;;  %v275_v58 = vadd.f32 %v271_v54, %v223_v22  ;;  %v168_v8 = vmul.f32 %v724_v4, %v1014_v47  ;;  %747 = vtanh.f32 %v185_v27  ;;  %v263_v12 = vadd.f32 %v1101_v48, %v257_v45  ;;  %s1288_s16 = sld [smem:[#allocation2 + $0x2f]] }
  0x4b   :  { %v728_v6 = vpop.eup %727  ;;  %v300_v15 = vadd.f32 %v296_v49, %v248_v55  ;;  %v297_v13 = vmul.f32 %v726_v39, %v1120_v14  ;;  %749 = vtanh.f32 %v211_v61  ;;  %v283_v26 = vmul.f32 %v1110_v60, %v950_v3  ;;  %s1297_s17 = sld [smem:[#allocation2 + $0x39]] }
  0x4c   :  { %v172_v16 = vadd.f32 %v168_v8, %v1139_v5  ;;  %v194_v19 = vmul.f32 %v728_v6, %v1035_v56  ;;  %751 = vtanh.f32 %v237_v18  ;;  %v1220_v48 = vstv %s1144_s21  ;;  %s1303_s18 = sld [smem:[#allocation2 + $0x26]] }
  0x4d   :  { %v730_v25 = vpop.eup %729  ;;  %v304_v34 = vadd.f32 %v300_v15, %v274_v41  ;;  %v301_v35 = vadd.f32 %v297_v13, %v249_v57  ;;  %753 = vtanh.f32 %v263_v12  ;;  %v289_v37 = vadd.f32 %v1118_v7, %v283_v26  ;;  %s1307_s19 = sld [smem:[#allocation2 + $0x30]] }
  0x4e   :  { %v732_v60 = vpop.eup %731  ;;  %v198_v5 = vadd.f32 %v194_v19, %v1141_v30  ;;  %v65_v40 = vmul.f32 %v730_v25, %v957_v10  ;;  %v1230_v28 = vstv %s1151_s22  ;;  %v1233_v43 = vstv %s1157_s23  ;;  %s1316_s0 = sld [smem:[#allocation2 + $0x3a]]  ;;  %s916_s23 = smov [#allocation7]  }
  0x4f   :  { %308 = vst [vmem:[#allocation7] sm:$0xff] %v304_v34  ;;  %v305_v21 = vadd.f32 %v301_v35, %v275_v58  ;;  %v220_v7 = vmul.f32 %v732_v60, %v1061_v11  ;;  %755 = vtanh.f32 %v289_v37  ;;  %v316_v44 = vmul.f32 %v1230_v28, %v944_v0  ;;  %s1321_s20 = sld [smem:[#allocation2 + $0x27]] }
  0x50   :  { %v734_v30 = vpop.eup %733  ;;  %v69_v10 = vadd.f32 %v65_v40, %v955_v9  ;;  %v1244_v46 = vstv %s1163_s24  ;;  %v1247_v17 = vstv %s1169_s25  ;;  %v1250_v22 = vstv %s1176_s1  ;;  %s1330_s21 = sld [smem:[#allocation2 + $0x31]]  ;;  %s588_s24 = sshll.u32 %s916_s23, 4  ;;  %s589_s24 = int_to_ptr.vmem [resolvable:$true] %s588_s24 }
  0x51   :  { %v736_v23 = vpop.eup %735  ;;  %309 = vst [vmem:[#allocation7 + $0x8] sm:$0xff] %v305_v21  ;;  %v224_v24 = vadd.f32 %v220_v7, %v172_v16  ;;  %v246_v52 = vmul.f32 %v734_v30, %v1086_v31  ;;  %v322_v55 = vadd.f32 %v1233_v43, %v316_v44  ;;  %v342_v53 = vmul.f32 %v1247_v17, %v944_v0  ;;  %s1338_s22 = sld [smem:[#allocation2 + $0x3b]]  ;;  %s866_s25 = scalar_lea.vmem %s589_s24, 512 }
  0x52   :  { %v738_v9 = vpop.eup %737  ;;  %v272_v33 = vmul.f32 %v736_v23, %v1104_v50  ;;  %v1262_v42 = vstv %s1181_s26  ;;  %v1265_v59 = vstv %s1185_s27  ;;  %v1268_v27 = vstv %s1191_s28  ;;  %p867_p5 = scmp.ne.s32.totalorder %s589_s24, %s866_s25  ;;  %p871_p6 = scmp.lt.s32.totalorder %s589_s24, %s589_s24 }
  0x53   :  { %v740_v51 = vpop.eup %739  ;;  %v250_v62 = vadd.f32 %v246_v52, %v198_v5  ;;  %v298_v32 = vmul.f32 %v738_v9, %v1120_v14  ;;  %757 = vtanh.f32 %v322_v55  ;;  %v348_v36 = vadd.f32 %v1250_v22, %v342_v53  ;;  %p872_p7 = scmp.lt.s32.totalorder %s866_s25, %s866_s25 }
  0x54   :  { %v742_v45 = vpop.eup %741  ;;  %v276_v63 = vadd.f32 %v272_v33, %v224_v24  ;;  %v91_v41 = vmul.f32 %v740_v51, %v965_v20  ;;  %v368_v54 = vmul.f32 %v1265_v59, %v944_v0  ;;  %v1280_v61 = vstv %s1198_s29 }
  0x55   :  { %v744_v4 = vpop.eup %743  ;;  %v302_v49 = vadd.f32 %v298_v32, %v250_v62  ;;  %v117_v57 = vmul.f32 %v742_v45, %v982_v29  ;;  %759 = vtanh.f32 %v348_v36  ;;  %v1286_v18 = vstv %s1202_s30  ;;  %p873_p8 = por %p872_p7, %p871_p6 }
  0x56   :  { %v746_v39 = vpop.eup %745  ;;  %v143_v20 = vmul.f32 %v744_v4, %v997_v38  ;;  %v374_v58 = vadd.f32 %v1268_v27, %v368_v54  ;;  %v394_v8 = vmul.f32 %v1286_v18, %v944_v0  ;;  %v1295_v12 = vstv %s1206_s4 }
  0x57   :  { %v748_v6 = vpop.eup %747  ;;  %v306_v29 = vadd.f32 %v302_v49, %v276_v63  ;;  %v121_v15 = vadd.f32 %v117_v57, %v69_v10  ;;  %v169_v13 = vmul.f32 %v746_v39, %v1014_v47  ;;  %v1301_v26 = vstv %s1210_s5  ;;  %p874_p9 = pnand %p873_p8, %p867_p5 }
  0x58   :  { %v750_v38 = vpop.eup %749  ;;  %v147_v16 = vadd.f32 %v143_v20, %v91_v41  ;;  %v195_v19 = vmul.f32 %v748_v6, %v1035_v56  ;;  %761 = vtanh.f32 %v374_v58  ;;  %v400_v25 = vadd.f32 %v1295_v12, %v394_v8 }
  0x59   :  { %v752_v34 = vpop.eup %751  ;;  %310 = vst [vmem:[#allocation7 + $0x10] sm:$0xff] %v306_v29  ;;  %v173_v35 = vadd.f32 %v169_v13, %v121_v15  ;;  %v221_v47 = vmul.f32 %v750_v38, %v1061_v11  ;;  %v1311_v37 = vstv %s1215_s6  ;;  %v1314_v60 = vstv %s1222_s7 }
  0x5a   :  { %v754_v56 = vpop.eup %753  ;;  %v199_v5 = vadd.f32 %v195_v19, %v147_v16  ;;  %v247_v40 = vmul.f32 %v752_v34, %v1086_v31  ;;  %763 = vtanh.f32 %v400_v25  ;;  %v420_v21 = vmul.f32 %v1311_v37, %v944_v0 }
  0x5b   :  { %v225_v11 = vadd.f32 %v221_v47, %v173_v35  ;;  %v273_v7 = vmul.f32 %v754_v56, %v1104_v50  ;;  %v1325_v44 = vstv %s1225_s8  ;;  %v1328_v30 = vstv %s1235_s9 }
  0x5c   :  { %v756_v10 = vpop.eup %755  ;;  %v251_v31 = vadd.f32 %v247_v40, %v199_v5  ;;  %v426_v23 = vadd.f32 %v1314_v60, %v420_v21  ;;  %v446_v24 = vmul.f32 %v1328_v30, %v944_v0  ;;  %v1336_v52 = vstv %s1240_s10 }
  0x5d   :  { %v277_v50 = vadd.f32 %v273_v7, %v225_v11  ;;  %v299_v55 = vmul.f32 %v756_v10, %v1120_v14  ;;  %v1342_v53 = vstv %s1252_s11  ;;  %v1345_v9 = vstv %s1258_s12 }
  0x5e   :  { %765 = vtanh.f32 %v426_v23  ;;  %v452_v33 = vadd.f32 %v1336_v52, %v446_v24  ;;  %v472_v51 = vmul.f32 %v1345_v9, %v944_v0  ;;  %v1351_v62 = vstv %s1270_s13 }
  0x5f   :  { %v303_v32 = vadd.f32 %v299_v55, %v251_v31  ;;  %v1354_v36 = vstv %s1274_s14  ;;  %v1357_v14 = vstv %s1282_s15  ;;  %v1360_v45 = vstv %s1288_s16 }
  0x60   :  { %v758_v63 = vpop.eup %757  ;;  %767 = vtanh.f32 %v452_v33  ;;  %v478_v41 = vadd.f32 %v1351_v62, %v472_v51  ;;  %v498_v54 = vmul.f32 %v1357_v14, %v944_v0  ;;  %v1366_v4 = vstv %s1297_s17 }
  0x61   :  { %v307_v49 = vadd.f32 %v303_v32, %v277_v50  ;;  %v332_v57 = vmul.f32 %v758_v63, %v1244_v46  ;;  %v1370_v39 = vstv %s1303_s18  ;;  %v1373_v20 = vstv %s1307_s19 }
  0x62   :  { %v760_v58 = vpop.eup %759  ;;  %769 = vtanh.f32 %v478_v41  ;;  %v504_v8 = vadd.f32 %v1360_v45, %v498_v54  ;;  %v524_v6 = vmul.f32 %v1370_v39, %v944_v0  ;;  %v1379_v29 = vstv %s1316_s0 }
  0x63   :  { %311 = vst [vmem:[#allocation7 + $0x18] sm:$0xff] %v307_v49  ;;  %v336_v15 = vadd.f32 %v332_v57, %v1220_v48  ;;  %v358_v13 = vmul.f32 %v760_v58, %v1262_v42  ;;  %v1384_v38 = vstv %s1321_s20  ;;  %v1387_v16 = vstv %s1330_s21 }
  0x64   :  { %771 = vtanh.f32 %v504_v8  ;;  %v530_v19 = vadd.f32 %v1373_v20, %v524_v6  ;;  %v550_v25 = vmul.f32 %v1384_v38, %v944_v0  ;;  %v1393_v34 = vstv %s1338_s22 }
  0x65   :  { %877 = shalt.err (!%p874_p9)
}
  0x66   :  { %591 = dma.vmem_to_hbm [thread:$0]  %s589_s24, 512, %s1529_s2, [#allocation4]   ;;  %v762_v35 = vpop.eup %761  ;;  %v317_v47 = vmul.f32 %v1230_v28, %v946_v1  ;;  %v343_v0 = vmul.f32 %v1247_v17, %v946_v1  ;;  %v369_v56 = vmul.f32 %v1265_v59, %v946_v1  ;;  %v395_v5 = vmul.f32 %v1286_v18, %v946_v1 }
  0x67   :  { %v384_v40 = vmul.f32 %v762_v35, %v1280_v61  ;;  %773 = vtanh.f32 %v530_v19  ;;  %v556_v21 = vadd.f32 %v1387_v16, %v550_v25  ;;  %v421_v11 = vmul.f32 %v1311_v37, %v946_v1  ;;  %v764_v7 = vpop.eup %763  ;;  %s917_s2 = smov [#allocation8]  }
  0x68   :  { %v323_v10 = vadd.f32 %v1233_v43, %v317_v47  ;;  %v349_v31 = vadd.f32 %v1250_v22, %v343_v0  ;;  %v375_v23 = vadd.f32 %v1268_v27, %v369_v56  ;;  %v401_v24 = vadd.f32 %v1295_v12, %v395_v5  ;;  %s598_s27 = sshll.u32 %s917_s2, 4  ;;  %s599_s27 = int_to_ptr.vmem [resolvable:$true] %s598_s27 }
  0x69   :  { %v388_v50 = vadd.f32 %v384_v40, %v336_v15  ;;  %v410_v55 = vmul.f32 %v764_v7, %v1301_v26  ;;  %775 = vtanh.f32 %v556_v21  ;;  %v427_v33 = vadd.f32 %v1314_v60, %v421_v11  ;;  %s886_s28 = scalar_lea.vmem %s599_s27, 512  ;;  %p891_p11 = scmp.lt.s32.totalorder %s599_s27, %s599_s27 }
  0x6a   :  { %777 = vtanh.f32 %v323_v10  ;;  %v447_v51 = vmul.f32 %v1328_v30, %v946_v1  ;;  %v473_v32 = vmul.f32 %v1345_v9, %v946_v1  ;;  %v499_v63 = vmul.f32 %v1357_v14, %v946_v1  ;;  %p887_p10 = scmp.ne.s32.totalorder %s599_s27, %s886_s28  ;;  %p892_p12 = scmp.lt.s32.totalorder %s886_s28, %s886_s28 }
  0x6b   :  { %v414_v41 = vadd.f32 %v410_v55, %v358_v13  ;;  %779 = vtanh.f32 %v349_v31  ;;  %v525_v54 = vmul.f32 %v1370_v39, %v946_v1  ;;  %v551_v49 = vmul.f32 %v1384_v38, %v946_v1  ;;  %v766_v57 = vpop.eup %765 }
  0x6c   :  { %781 = vtanh.f32 %v375_v23  ;;  %v453_v58 = vadd.f32 %v1336_v52, %v447_v51  ;;  %v479_v8 = vadd.f32 %v1351_v62, %v473_v32  ;;  %v505_v6 = vadd.f32 %v1360_v45, %v499_v63  ;;  %p893_p13 = por %p892_p12, %p891_p11 }
  0x6d   :  { %v436_v15 = vmul.f32 %v766_v57, %v1325_v44  ;;  %783 = vtanh.f32 %v401_v24  ;;  %v531_v13 = vadd.f32 %v1373_v20, %v525_v54  ;;  %v557_v19 = vadd.f32 %v1387_v16, %v551_v49  ;;  %v768_v25 = vpop.eup %767 }
  0x6e   :  { %785 = vtanh.f32 %v427_v33  ;;  %v318_v1 = vmul.f32 %v1230_v28, %v948_v2  ;;  %v344_v35 = vmul.f32 %v1247_v17, %v948_v2  ;;  %v370_v47 = vmul.f32 %v1265_v59, %v948_v2  ;;  %p894_p0 = pnand %p893_p13, %p887_p10 }
  0x6f   :  { %v440_v0 = vadd.f32 %v436_v15, %v388_v50  ;;  %v462_v56 = vmul.f32 %v768_v25, %v1342_v53  ;;  %787 = vtanh.f32 %v453_v58  ;;  %v396_v5 = vmul.f32 %v1286_v18, %v948_v2  ;;  %v770_v40 = vpop.eup %769 }
  0x70   :  { %789 = vtanh.f32 %v479_v8  ;;  %v324_v21 = vadd.f32 %v1233_v43, %v318_v1  ;;  %v350_v11 = vadd.f32 %v1250_v22, %v344_v35  ;;  %v376_v7 = vadd.f32 %v1268_v27, %v370_v47 }
  0x71   :  { %v466_v10 = vadd.f32 %v462_v56, %v414_v41  ;;  %v488_v31 = vmul.f32 %v770_v40, %v1354_v36  ;;  %791 = vtanh.f32 %v505_v6  ;;  %v402_v23 = vadd.f32 %v1295_v12, %v396_v5  ;;  %v772_v24 = vpop.eup %771 }
  0x72   :  { %793 = vtanh.f32 %v531_v13  ;;  %v422_v50 = vmul.f32 %v1311_v37, %v948_v2  ;;  %v448_v55 = vmul.f32 %v1328_v30, %v948_v2  ;;  %v474_v33 = vmul.f32 %v1345_v9, %v948_v2 }
  0x73   :  { %v492_v51 = vadd.f32 %v488_v31, %v440_v0  ;;  %v514_v32 = vmul.f32 %v772_v24, %v1366_v4  ;;  %795 = vtanh.f32 %v557_v19  ;;  %v500_v63 = vmul.f32 %v1357_v14, %v948_v2 }
  0x74   :  { %v774_v41 = vpop.eup %773  ;;  %797 = vtanh.f32 %v324_v21  ;;  %v428_v54 = vadd.f32 %v1314_v60, %v422_v50  ;;  %v454_v49 = vadd.f32 %v1336_v52, %v448_v55  ;;  %v480_v57 = vadd.f32 %v1351_v62, %v474_v33 }
  0x75   :  { %v518_v58 = vadd.f32 %v514_v32, %v466_v10  ;;  %v540_v8 = vmul.f32 %v774_v41, %v1379_v29  ;;  %799 = vtanh.f32 %v350_v11  ;;  %v506_v6 = vadd.f32 %v1360_v45, %v500_v63 }
  0x76   :  { %v776_v15 = vpop.eup %775  ;;  %801 = vtanh.f32 %v376_v7  ;;  %v526_v13 = vmul.f32 %v1370_v39, %v948_v2  ;;  %v552_v19 = vmul.f32 %v1384_v38, %v948_v2  ;;  %v319_v25 = vmul.f32 %v1230_v28, %v950_v3 }
  0x77   :  { %v778_v1 = vpop.eup %777  ;;  %v544_v35 = vadd.f32 %v540_v8, %v492_v51  ;;  %v566_v47 = vmul.f32 %v776_v15, %v1393_v34  ;;  %803 = vtanh.f32 %v402_v23  ;;  %v345_v0 = vmul.f32 %v1247_v17, %v950_v3 }
  0x78   :  { %v780_v56 = vpop.eup %779  ;;  %v333_v5 = vmul.f32 %v778_v1, %v1244_v46  ;;  %805 = vtanh.f32 %v428_v54  ;;  %v532_v40 = vadd.f32 %v1373_v20, %v526_v13  ;;  %v558_v21 = vadd.f32 %v1387_v16, %v552_v19 }
  0x79   :  { %v782_v2 = vpop.eup %781  ;;  %v570_v11 = vadd.f32 %v566_v47, %v518_v58  ;;  %v359_v28 = vmul.f32 %v780_v56, %v1262_v42  ;;  %807 = vtanh.f32 %v454_v49  ;;  %v325_v7 = vadd.f32 %v1233_v43, %v319_v25 }
  0x7a   :  { %v784_v10 = vpop.eup %783  ;;  %v337_v31 = vadd.f32 %v333_v5, %v1220_v48  ;;  %v385_v17 = vmul.f32 %v782_v2, %v1280_v61  ;;  %809 = vtanh.f32 %v480_v57  ;;  %v351_v23 = vadd.f32 %v1250_v22, %v345_v0 }
  0x7b   :  { %v786_v24 = vpop.eup %785  ;;  %v574_v50 = vadd.f32 %v570_v11, %v544_v35  ;;  %v411_v55 = vmul.f32 %v784_v10, %v1301_v26  ;;  %811 = vtanh.f32 %v506_v6  ;;  %v371_v33 = vmul.f32 %v1265_v59, %v950_v3 }
  0x7c   :  { %v788_v51 = vpop.eup %787  ;;  %v389_v32 = vadd.f32 %v385_v17, %v337_v31  ;;  %v437_v43 = vmul.f32 %v786_v24, %v1325_v44  ;;  %813 = vtanh.f32 %v532_v40  ;;  %v397_v63 = vmul.f32 %v1286_v18, %v950_v3  ;;  %v837_v3 = vld [vmem:[#allocation6 + $0x18] sm:$0xff] }
  0x7d   :  { %v790_v41 = vpop.eup %789  ;;  %578 = vst [vmem:[#allocation8] sm:$0xff] %v574_v50  ;;  %v415_v54 = vadd.f32 %v411_v55, %v359_v28  ;;  %v463_v22 = vmul.f32 %v788_v51, %v1342_v53  ;;  %815 = vtanh.f32 %v558_v21  ;;  %v377_v49 = vadd.f32 %v1268_v27, %v371_v33 }
  0x7e   :  { %v792_v57 = vpop.eup %791  ;;  %v441_v58 = vadd.f32 %v437_v43, %v389_v32  ;;  %v489_v59 = vmul.f32 %v790_v41, %v1354_v36  ;;  %817 = vtanh.f32 %v325_v7  ;;  %v403_v8 = vadd.f32 %v1295_v12, %v397_v63 }
  0x7f   :  { %v794_v6 = vpop.eup %793  ;;  %v467_v15 = vadd.f32 %v463_v22, %v415_v54  ;;  %v515_v13 = vmul.f32 %v792_v57, %v1366_v4  ;;  %819 = vtanh.f32 %v351_v23  ;;  %v423_v18 = vmul.f32 %v837_v3, %v1311_v37 }
  0x80   :  { %v796_v19 = vpop.eup %795  ;;  %v493_v25 = vadd.f32 %v489_v59, %v441_v58  ;;  %v541_v1 = vmul.f32 %v794_v6, %v1379_v29  ;;  %821 = vtanh.f32 %v377_v49  ;;  %v449_v27 = vmul.f32 %v837_v3, %v1328_v30 }
  0x81   :  { %v798_v35 = vpop.eup %797  ;;  %v519_v47 = vadd.f32 %v515_v13, %v467_v15  ;;  %v567_v0 = vmul.f32 %v796_v19, %v1393_v34  ;;  %823 = vtanh.f32 %v403_v8  ;;  %v429_v12 = vadd.f32 %v1314_v60, %v423_v18 }
  0x82   :  { %v800_v56 = vpop.eup %799  ;;  %v545_v5 = vadd.f32 %v541_v1, %v493_v25  ;;  %v334_v40 = vmul.f32 %v798_v35, %v1244_v46  ;;  %v455_v37 = vadd.f32 %v1336_v52, %v449_v27  ;;  %v475_v21 = vmul.f32 %v837_v3, %v1345_v9 }
  0x83   :  { %v802_v2 = vpop.eup %801  ;;  %v571_v11 = vadd.f32 %v567_v0, %v519_v47  ;;  %v360_v28 = vmul.f32 %v800_v56, %v1262_v42  ;;  %825 = vtanh.f32 %v429_v12  ;;  %v501_v30 = vmul.f32 %v837_v3, %v1357_v14 }
  0x84   :  { %v804_v7 = vpop.eup %803  ;;  %v338_v10 = vadd.f32 %v334_v40, %v1220_v48  ;;  %v386_v60 = vmul.f32 %v802_v2, %v1280_v61  ;;  %827 = vtanh.f32 %v455_v37  ;;  %v481_v31 = vadd.f32 %v1351_v62, %v475_v21 }
  0x85   :  { %v806_v17 = vpop.eup %805  ;;  %v575_v23 = vadd.f32 %v571_v11, %v545_v5  ;;  %v412_v52 = vmul.f32 %v804_v7, %v1301_v26  ;;  %v507_v9 = vadd.f32 %v1360_v45, %v501_v30  ;;  %v527_v24 = vmul.f32 %v837_v3, %v1370_v39 }
  0x86   :  { %v808_v50 = vpop.eup %807  ;;  %v390_v55 = vadd.f32 %v386_v60, %v338_v10  ;;  %v438_v14 = vmul.f32 %v806_v17, %v1325_v44  ;;  %829 = vtanh.f32 %v481_v31  ;;  %v553_v33 = vmul.f32 %v837_v3, %v1384_v38 }
  0x87   :  { %v810_v51 = vpop.eup %809  ;;  %579 = vst [vmem:[#allocation8 + $0x8] sm:$0xff] %v575_v23  ;;  %v416_v32 = vadd.f32 %v412_v52, %v360_v28  ;;  %v464_v62 = vmul.f32 %v808_v50, %v1342_v53  ;;  %831 = vtanh.f32 %v507_v9  ;;  %v533_v43 = vadd.f32 %v1373_v20, %v527_v24 }
  0x88   :  { %v812_v63 = vpop.eup %811  ;;  %v442_v41 = vadd.f32 %v438_v14, %v390_v55  ;;  %v490_v45 = vmul.f32 %v810_v51, %v1354_v36  ;;  %v559_v39 = vadd.f32 %v1387_v16, %v553_v33 }
  0x89   :  { %v814_v54 = vpop.eup %813  ;;  %v468_v22 = vadd.f32 %v464_v62, %v416_v32  ;;  %v516_v49 = vmul.f32 %v812_v63, %v1366_v4  ;;  %833 = vtanh.f32 %v533_v43 }
  0x8a   :  { %v816_v38 = vpop.eup %815  ;;  %v494_v57 = vadd.f32 %v490_v45, %v442_v41  ;;  %v542_v58 = vmul.f32 %v814_v54, %v1379_v29  ;;  %835 = vtanh.f32 %v559_v39 }
  0x8b   :  { %v818_v59 = vpop.eup %817  ;;  %v520_v8 = vadd.f32 %v516_v49, %v468_v22  ;;  %v568_v20 = vmul.f32 %v816_v38, %v1393_v34 }
  0x8c   :  { %v820_v6 = vpop.eup %819  ;;  %v546_v15 = vadd.f32 %v542_v58, %v494_v57  ;;  %v335_v13 = vmul.f32 %v818_v59, %v1244_v46 }
  0x8d   :  { %v822_v3 = vpop.eup %821  ;;  %v572_v16 = vadd.f32 %v568_v20, %v520_v8  ;;  %v361_v18 = vmul.f32 %v820_v6, %v1262_v42 }
  0x8e   :  { %v824_v19 = vpop.eup %823  ;;  %v339_v25 = vadd.f32 %v335_v13, %v1220_v48  ;;  %v387_v1 = vmul.f32 %v822_v3, %v1280_v61 }
  0x8f   :  { %v576_v27 = vadd.f32 %v572_v16, %v546_v15  ;;  %v413_v35 = vmul.f32 %v824_v19, %v1301_v26 }
  0x90   :  { %v826_v47 = vpop.eup %825  ;;  %v391_v0 = vadd.f32 %v387_v1, %v339_v25 }
  0x91   :  { %v828_v12 = vpop.eup %827  ;;  %580 = vst [vmem:[#allocation8 + $0x10] sm:$0xff] %v576_v27  ;;  %v417_v56 = vadd.f32 %v413_v35, %v361_v18  ;;  %v439_v5 = vmul.f32 %v826_v47, %v1325_v44 }
  0x92   :  { %v465_v46 = vmul.f32 %v828_v12, %v1342_v53 }
  0x93   :  { %v830_v40 = vpop.eup %829  ;;  %v443_v37 = vadd.f32 %v439_v5, %v391_v0 }
  0x94   :  { %v832_v42 = vpop.eup %831  ;;  %v469_v21 = vadd.f32 %v465_v46, %v417_v56  ;;  %v491_v48 = vmul.f32 %v830_v40, %v1354_v36 }
  0x95   :  { %v517_v61 = vmul.f32 %v832_v42, %v1366_v4 }
  0x96   :  { %v834_v2 = vpop.eup %833  ;;  %v495_v11 = vadd.f32 %v491_v48, %v443_v37 }
  0x97   :  { %v836_v26 = vpop.eup %835  ;;  %v521_v28 = vadd.f32 %v517_v61, %v469_v21  ;;  %v543_v30 = vmul.f32 %v834_v2, %v1379_v29 }
  0x98   :  { %v569_v7 = vmul.f32 %v836_v26, %v1393_v34 }
  0x99   :  { %v547_v10 = vadd.f32 %v543_v30, %v495_v11 }
  0x9a   :  { %v573_v44 = vadd.f32 %v569_v7, %v521_v28 }
  0x9c   :  { %v577_v53 = vadd.f32 %v573_v44, %v547_v10 }
  0x9e   :  { %581 = vst [vmem:[#allocation8 + $0x18] sm:$0xff] %v577_v53 }
  0x9f   :  { %897 = shalt.err (!%p894_p0)
}
  0xa0   :  { %601 = dma.vmem_to_hbm [thread:$0]  %s599_s27, 512, %s1530_s3, [#allocation9]  }
  0xa1   :  { %910 = dma.done.wait [#allocation4], 512  }
  0xa2   :  { %911 = vsyncadd [#allocation4], 4294966784 }
  0xa3   :  { %912 = dma.done.wait [#allocation9], 512  }
  0xa4   :  { %913 = vsyncadd [#allocation9], 4294966784 }
  0xa5   :  { %608 = vsyncpa [#allocation3], 1 }
  0xa6   :  { %609 = vsyncpa [#allocation4], 1 }
  0xa7   :  { %610 = vsyncpa [#allocation9], 1 }
  0xa8   :  { %611 = vsyncpa [#allocation5], 1 }

</bundles_post_ra>
